<compile_context>
chip_gen: v7x
topology: tpu7x:2x2x1
jax: 0.10.0
libtpu: 0.0.40
codegen_flags: <defaults>
</compile_context>

<pallas_src>
import functools
import numpy as np
import jax
import jax.numpy as jnp
from jax.experimental import pallas as pl
from jax.experimental.pallas import tpu as pltpu

# ----- STFT config (mirrors the PyTorch module __init__ args) -----
FILTER_LENGTH = 16
HOP_LENGTH = 4
WIN_LENGTH = 16
WINDOW = "hann"
MAX_FRAMES = 32
CUTOFF = FILTER_LENGTH // 2 + 1
SCALE = FILTER_LENGTH / HOP_LENGTH
TINY = float(np.finfo(np.float32).tiny)


def _round_up(x, m):
    return ((x + m - 1) // m) * m


def _pick_bm(B):
    """Batch rows per grid step.

    Fill the MXU M dimension (up to 128 rows) instead of a fixed 8, but keep at
    least 2 grid steps when the batch allows it so the 'parallel' axis can be
    split across the 2 TensorCores per chip on v7x.
    """
    bpad = _round_up(B, 8)
    bm = min(128, bpad)
    if bpad > 8:
        bm = min(bm, _round_up((bpad + 1) // 2, 8))
    return max(bm, 8)


# ---------------- deterministic buffer construction (numpy glue) ----------------
def _hann_periodic(win_length):
    # scipy.signal.get_window("hann", win_length, fftbins=True)
    n = np.arange(win_length)
    return 0.5 - 0.5 * np.cos(2.0 * np.pi * n / win_length)


def _pad_center(w, size):
    lpad = (size - len(w)) // 2
    return np.pad(w, (lpad, size - len(w) - lpad))


def _window_sumsquare(n_frames, hop_length, win_length, n_fft):
    n = n_fft + hop_length * (n_frames - 1)
    x = np.zeros(n, dtype=np.float32)
    win_sq = _hann_periodic(win_length) ** 2      # librosa normalize(norm=None) is identity
    win_sq = _pad_center(win_sq, n_fft)
    for i in range(n_frames):
        s = i * hop_length
        x[s:min(n, s + n_fft)] += win_sq[:max(0, min(n_fft, n - s))]
    return x


def build_buffers():
    fourier_basis = np.fft.fft(np.eye(FILTER_LENGTH))
    fourier_basis = np.vstack([np.real(fourier_basis[:CUTOFF, :]),
                               np.imag(fourier_basis[:CUTOFF, :])])
    inverse_basis = np.linalg.pinv(SCALE * fourier_basis).T.astype(np.float32)   # (2*CUTOFF, FL)
    fft_window = _pad_center(_hann_periodic(WIN_LENGTH), FILTER_LENGTH).astype(np.float32)
    inverse_basis = inverse_basis * fft_window[None, :]
    window_sum = _window_sumsquare(MAX_FRAMES, HOP_LENGTH, WIN_LENGTH, FILTER_LENGTH)
    return inverse_basis, window_sum.astype(np.float32)


_INVERSE_BASIS, _WINDOW_SUM = build_buffers()      # module-level: built exactly once


@functools.lru_cache(maxsize=None)
def _folded_constants(T):
    """Folded conv_transpose1d basis for T frames, with normalization folded in.

    Returns a device-resident jnp array (cached per T, uploaded once):
      basis : (2*CTpad, Npad)  merged [cos ; sin] overlap-add basis whose columns
              are pre-multiplied by (scale / window_sum where > tiny, else scale);
              zero rows/cols in padding.
    """
    fl, hop, C = FILTER_LENGTH, HOP_LENGTH, CUTOFF
    N = fl + hop * (T - 1)                 # conv_transpose1d output length
    CT = C * T
    CTpad = _round_up(CT, 128)
    Npad = _round_up(N, 128)

    W = _INVERSE_BASIS                     # (2*C, fl)
    basis = np.zeros((2 * CTpad, Npad), np.float32)
    for c in range(C):
        for f in range(T):
            s = f * hop
            basis[c * T + f, s:s + fl] = W[c]              # cos (real) half
            basis[CTpad + c * T + f, s:s + fl] = W[C + c]  # sin (imag) half

    # Fold normalization factor into the basis columns: (lhs @ B) * f == lhs @ (B * f)
    win = _WINDOW_SUM[:N]
    fac = np.where(win > TINY, SCALE / win, SCALE).astype(np.float32)
    basis[:, :N] *= fac[None, :]

    return jnp.asarray(basis), N, Npad, CTpad


# ------------------------------- Pallas kernel -------------------------------
def _istft_kernel(mag_ref, ph_ref, basis_ref, out_ref):
    # mag_ref / ph_ref : (BM, CTpad)     flattened (channel*frame) spectra, zero-padded
    # basis_ref        : (2*CTpad, Npad) merged [cos ; sin] overlap-add basis (norm folded in)
    # out_ref          : (BM, Npad)      lane-dense padded waveform block
    ctpad = mag_ref.shape[-1]
    mag = mag_ref[...]
    ph = ph_ref[...]
    mc = mag * jnp.cos(ph)                               # magnitude * cos(phase)
    ms = mag * jnp.sin(ph)                               # magnitude * sin(phase)
    # Two dots on static, sublane-aligned basis slices (no concat staging buffer).
    acc = jnp.dot(mc, basis_ref[:ctpad, :], preferred_element_type=jnp.float32)
    acc = acc + jnp.dot(ms, basis_ref[ctpad:, :], preferred_element_type=jnp.float32)
    out_ref[...] = acc


def stft_inverse(magnitude, phase):
    """Pallas implementation of STFT.forward(magnitude, phase)."""
    B, C, T = magnitude.shape
    assert C == CUTOFF and T <= MAX_FRAMES
    basis, N, Npad, CTpad = _folded_constants(T)
    CT = C * T
    bm = _pick_bm(B)
    Bpad = _round_up(B, bm)

    mag2 = jnp.pad(magnitude.astype(jnp.float32).reshape(B, CT),
                   ((0, Bpad - B), (0, CTpad - CT)))
    ph2 = jnp.pad(phase.astype(jnp.float32).reshape(B, CT),
                  ((0, Bpad - B), (0, CTpad - CT)))

    out = pl.pallas_call(
        _istft_kernel,
        out_shape=jax.ShapeDtypeStruct((Bpad, Npad), jnp.float32),
        grid=(Bpad // bm,),
        in_specs=[
            pl.BlockSpec((bm, CTpad), lambda b: (b, 0)),
            pl.BlockSpec((bm, CTpad), lambda b: (b, 0)),
            pl.BlockSpec((2 * CTpad, Npad), lambda b: (0, 0)),
        ],
        out_specs=pl.BlockSpec((bm, Npad), lambda b: (b, 0)),
        compiler_params=pltpu.CompilerParams(
            dimension_semantics=("parallel",)),
    )(mag2, ph2, basis)

    half = FILTER_LENGTH // 2
    return out[:B, half:N - half][:, None, :]       # == [..., fl//2:][..., :-fl//2]


# ----------------------- pure-JAX reference (for checking) -----------------------
def stft_inverse_ref(magnitude, phase):
    B, C, T = magnitude.shape
    fl, hop = FILTER_LENGTH, HOP_LENGTH
    N = fl + hop * (T - 1)
    W = jnp.asarray(_INVERSE_BASIS, jnp.float32)            # (2C, fl)
    rc = jnp.concatenate([magnitude * jnp.cos(phase),
                          magnitude * jnp.sin(phase)], axis=1)   # (B, 2C, T)
    frames = jnp.einsum("bcf,ck->bfk", rc.astype(jnp.float32), W)  # (B, T, fl)
    out = jnp.zeros((B, N), jnp.float32)
    for f in range(T):
        out = out.at[:, f * hop:f * hop + fl].add(frames[:, f])
    win = jnp.asarray(_WINDOW_SUM, jnp.float32)[:N]
    out = jnp.where(win > TINY, out / win, out) * SCALE
    half = fl // 2
    return out[:, None, half:N - half]


if __name__ == "__main__":
    B, T = 2, 8                                        # batch, number of STFT frames
    key = jax.random.PRNGKey(0)
    k1, k2 = jax.random.split(key)
    magnitude = jax.random.uniform(k1, (B, CUTOFF, T), jnp.float32)
    phase = jax.random.uniform(k2, (B, CUTOFF, T), jnp.float32,
                               minval=-np.pi, maxval=np.pi)

    out = jax.block_until_ready(stft_inverse(magnitude, phase))
    ref = jax.block_until_ready(stft_inverse_ref(magnitude, phase))

    assert out.shape == (B, 1, HOP_LENGTH * (T - 1)), out.shape
    np.testing.assert_allclose(np.asarray(out), np.asarray(ref), rtol=1e-3, atol=1e-3)
    print("KERNEL_OK")
</pallas_src>

<mosaic_0001>
module attributes {stable_mosaic.version = 11 : i64} {
  func.func @_istft_kernel(%arg0: i32, %arg1: memref<8x128xf32, #tpu.memory_space<vmem>>, %arg2: memref<8x128xf32, #tpu.memory_space<vmem>>, %arg3: memref<256x128xf32, #tpu.memory_space<vmem>>, %arg4: memref<8x128xf32, #tpu.memory_space<vmem>>) attributes {dimension_semantics = [#tpu.dimension_semantics<parallel>], iteration_bounds = array<i64: 1>, scalar_prefetch = 0 : i64, scratch_operands = 0 : i64, tpu.core_type = #tpu.core_type<tc>, window_params = [{transform_indices = @transform_0, window_bounds = array<i64: 8, 128>}, {transform_indices = @transform_1, window_bounds = array<i64: 8, 128>}, {pipeline_mode = #tpu.pipeline_mode<synchronous>, transform_indices = @transform_2, window_bounds = array<i64: 256, 128>}, {transform_indices = @transform_3, window_bounds = array<i64: 8, 128>}]} {
    %c0 = arith.constant 0 : index
    %c0_0 = arith.constant 0 : index
    %0 = vector.load %arg1[%c0, %c0_0] : memref<8x128xf32, #tpu.memory_space<vmem>>, vector<8x128xf32>
    %c0_1 = arith.constant 0 : index
    %c0_2 = arith.constant 0 : index
    %1 = vector.load %arg2[%c0_1, %c0_2] : memref<8x128xf32, #tpu.memory_space<vmem>>, vector<8x128xf32>
    %2 = math.cos %1 : vector<8x128xf32>
    %3 = arith.mulf %0, %2 : vector<8x128xf32>
    %4 = math.sin %1 : vector<8x128xf32>
    %5 = arith.mulf %0, %4 : vector<8x128xf32>
    %c0_3 = arith.constant 0 : index
    %c0_4 = arith.constant 0 : index
    %6 = vector.load %arg3[%c0_3, %c0_4] : memref<256x128xf32, #tpu.memory_space<vmem>>, vector<128x128xf32>
    %cst = arith.constant dense<0.000000e+00> : vector<8x128xf32>
    %7 = tpu.matmul %3, %6, %cst {dimension_numbers = #tpu.dot_dimension_numbers<[1], [0], [0], [1], [0, 0, 1, 1], [], []>} : vector<8x128xf32>, vector<128x128xf32>, vector<8x128xf32> -> vector<8x128xf32>
    %c128 = arith.constant 128 : index
    %c0_5 = arith.constant 0 : index
    %8 = vector.load %arg3[%c128, %c0_5] : memref<256x128xf32, #tpu.memory_space<vmem>>, vector<128x128xf32>
    %cst_6 = arith.constant dense<0.000000e+00> : vector<8x128xf32>
    %9 = tpu.matmul %5, %8, %cst_6 {dimension_numbers = #tpu.dot_dimension_numbers<[1], [0], [0], [1], [0, 0, 1, 1], [], []>} : vector<8x128xf32>, vector<128x128xf32>, vector<8x128xf32> -> vector<8x128xf32>
    %10 = arith.addf %7, %9 : vector<8x128xf32>
    %c0_7 = arith.constant 0 : index
    %c0_8 = arith.constant 0 : index
    %11 = vector.load %arg4[%c0_7, %c0_8] : memref<8x128xf32, #tpu.memory_space<vmem>>, vector<8x128xf32>
    tpu.vector_store %arg4[%c0_7, %c0_8], %10 {strides = array<i32>} : memref<8x128xf32, #tpu.memory_space<vmem>>, vector<8x128xf32>,
    return
  }
  func.func @transform_0(%arg0: i32) -> (i32, i32) {
    %c0_i32 = arith.constant 0 : i32
    %c0_i32_0 = arith.constant 0 : i32
    return %arg0, %c0_i32 : i32, i32
  }
  func.func @transform_1(%arg0: i32) -> (i32, i32) {
    %c0_i32 = arith.constant 0 : i32
    %c0_i32_0 = arith.constant 0 : i32
    return %arg0, %c0_i32 : i32, i32
  }
  func.func @transform_2(%arg0: i32) -> (i32, i32) {
    %c0_i32 = arith.constant 0 : i32
    %c0_i32_0 = arith.constant 0 : i32
    %c0_i32_1 = arith.constant 0 : i32
    return %c0_i32, %c0_i32_0 : i32, i32
  }
  func.func @transform_3(%arg0: i32) -> (i32, i32) {
    %c0_i32 = arith.constant 0 : i32
    %c0_i32_0 = arith.constant 0 : i32
    return %arg0, %c0_i32 : i32, i32
  }
}

</mosaic_0001>

<bundles_post_ra>
// kernel: tpu_custom_call.1
= control target key start
LH: loop header
LB: loop body
LE: loop exit
PB: predicated region body
PF: predicated region fallthrough
CT: control target
= control target key end

     0   :  { %8 = vsyncpa [#allocation3], 0  ;;  %s853_s0 = inlined_call_operand.hbm [shape: f32[8,128], index: 0, kind: input, shape index: {}]   ;;  %s854_s1 = inlined_call_operand.hbm [shape: f32[8,128], index: 1, kind: input, shape index: {}]   ;;  %s855_s2 = inlined_call_operand.hbm [shape: f32[256,128], index: 2, kind: input, shape index: {}]   ;;  %s856_s3 = inlined_call_operand.hbm [shape: f32[8,128], index: 3, kind: output, shape index: {}]  }
   0x1   :  { %9 = vsyncpa [#allocation6], 0 }
   0x2   :  { %10 = vsyncpa [#allocation4], 0  ;;  %s730_s12 = smov [#allocation5]   ;;  %s731_s14 = smov [#allocation2]  }
   0x3   :  { %s27_s13 = sshll.u32 %s730_s12, 4  ;;  %s17_s15 = sshll.u32 %s731_s14, 4  ;;  %s28_s13 = int_to_ptr.vmem [resolvable:$true] %s27_s13  ;;  %s18_s15 = int_to_ptr.vmem [resolvable:$true] %s17_s15 }
   0x4   :  { %s636_s18 = scalar_lea.hbm %s854_s1, 128 }
   0x5   :  { %p637_p0 = scmp.ne.s32.totalorder %s854_s1, %s636_s18  ;;  %p640_p1 = scmp.lt.u32.totalorder %s636_s18, %s854_s1 }
   0x7   :  { %p642_p2 = pnand %p640_p1, %p637_p0 }
   0x9   :  { %645 = shalt.err (!%p642_p2)
}
   0xa   :  { %s646_s23 = scalar_lea.vmem %s28_s13, 128  ;;  %p651_p4 = scmp.lt.s32.totalorder %s28_s13, %s28_s13 }
   0xb   :  { %p647_p3 = scmp.ne.s32.totalorder %s28_s13, %s646_s23  ;;  %p652_p5 = scmp.lt.s32.totalorder %s646_s23, %s646_s23 }
   0xd   :  { %p653_p6 = por %p652_p5, %p651_p4 }
   0xf   :  { %p654_p7 = pnand %p653_p6, %p647_p3 }
  0x11   :  { %657 = shalt.err (!%p654_p7)
}
  0x12   :  { %30 = dma.hbm_to_vmem [thread:$0]  %s854_s1, 128, %s28_s13, [#allocation6]  }
  0x13   :  { %s658_s28 = scalar_lea.hbm %s853_s0, 128 }
  0x14   :  { %p659_p8 = scmp.ne.s32.totalorder %s853_s0, %s658_s28  ;;  %p662_p9 = scmp.lt.u32.totalorder %s658_s28, %s853_s0 }
  0x16   :  { %p664_p10 = pnand %p662_p9, %p659_p8 }
  0x18   :  { %667 = shalt.err (!%p664_p10)
}
  0x19   :  { %s668_s6 = scalar_lea.vmem %s18_s15, 128  ;;  %p673_p12 = scmp.lt.s32.totalorder %s18_s15, %s18_s15 }
  0x1a   :  { %p669_p11 = scmp.ne.s32.totalorder %s18_s15, %s668_s6  ;;  %p674_p13 = scmp.lt.s32.totalorder %s668_s6, %s668_s6 }
  0x1c   :  { %p675_p0 = por %p674_p13, %p673_p12 }
  0x1e   :  { %p676_p1 = pnand %p675_p0, %p669_p11 }
  0x20   :  { %679 = shalt.err (!%p676_p1)
}
  0x21   :  { %20 = dma.hbm_to_vmem [thread:$0]  %s853_s0, 128, %s18_s15, [#allocation3]  }
  0x22   :  { %s732_s8 = smov [#allocation7]   ;;  %s680_s12 = scalar_lea.hbm %s855_s2, 4096 }
  0x23   :  { %s36_s9 = sshll.u32 %s732_s8, 4  ;;  %p681_p2 = scmp.ne.s32.totalorder %s855_s2, %s680_s12  ;;  %s37_s9 = int_to_ptr.vmem [resolvable:$true] %s36_s9 }
  0x24   :  { %p684_p3 = scmp.lt.u32.totalorder %s680_s12, %s855_s2 }
  0x26   :  { %p686_p4 = pnand %p684_p3, %p681_p2 }
  0x28   :  { %689 = shalt.err (!%p686_p4)
}
  0x29   :  { %s690_s18 = scalar_lea.vmem %s37_s9, 4096  ;;  %p695_p6 = scmp.lt.s32.totalorder %s37_s9, %s37_s9 }
  0x2a   :  { %p691_p5 = scmp.ne.s32.totalorder %s37_s9, %s690_s18  ;;  %p696_p7 = scmp.lt.s32.totalorder %s690_s18, %s690_s18 }
  0x2c   :  { %p697_p8 = por %p696_p7, %p695_p6 }
  0x2e   :  { %p698_p9 = pnand %p697_p8, %p691_p5 }
  0x30   :  { %701 = shalt.err (!%p698_p9)
}
  0x31   :  { %s733_s0 = smov 128   ;;  %s734_s15 = smov 8  }
  0x32   :  { %42 = dma.hbm_to_vmem [thread:$0]  %s855_s2, 4096, %s37_s9, [#allocation6], %s733_s0, %s733_s0, %s734_s15  }
  0x33   :  { %724 = dma.done.wait [#allocation3], 128  }
  0x34   :  { %725 = vsyncadd [#allocation3], 4294967168 }
  0x35   :  { %726 = dma.done.wait [#allocation6], 4224  }
  0x36   :  { %727 = vsyncadd [#allocation6], 4294963072  ;;  %v735_v0 = vmov 0.0|0.0   ;;  %vm736_vm0 = vmmov 0   ;;  %v737_v1 = vmov 0.0   ;;  %v279_v2 = vld [vmem:[#allocation7 + $0x80] sm:$0xff] }
  0x37   :  { %564 = vmatprep.subr.bf16.mxu1 %v735_v0  ;;  %588 = vmatprep.subr.bf16.mxu0 %v735_v0  ;;  %v280_v3 = vld [vmem:[#allocation7 + $0x88] sm:$0xff]  ;;  %v263_v4 = vld [vmem:[#allocation7] sm:$0xff]  ;;  %v281_v7 = vld [vmem:[#allocation7 + $0x90] sm:$0xff]  ;;  %v738_v60 = vmov 683565275   ;;  %s744_s2 = smov [#allocation8]  }
  0x38   :  { %526 = vmatprep.mubr.msk.f32.mxu1 %vm736_vm0, %v737_v1  ;;  %561 = vmatprep.mubr.msk.f32.mxu0 %vm736_vm0, %v737_v1  ;;  %v565_v5 = vpack.c.bf16 %v280_v3, %v279_v2  ;;  %v264_v6 = vld [vmem:[#allocation7 + $0x8] sm:$0xff]  ;;  %v282_v8 = vld [vmem:[#allocation7 + $0x98] sm:$0xff]  ;;  %v265_v10 = vld [vmem:[#allocation7 + $0x10] sm:$0xff]  ;;  %v739_v62 = vmov 2475754826   ;;  %s442_s21 = sshll.u32 %s744_s2, 4  ;;  %s443_s21 = int_to_ptr.vmem [resolvable:$true] %s442_s21 }
  0x39   :  { %v589_v9 = vpack.c.bf16 %v264_v6, %v263_v4  ;;  %v266_v11 = vld [vmem:[#allocation7 + $0x18] sm:$0xff]  ;;  %v568_v12 = vpack.c.bf16 %v282_v8, %v281_v7  ;;  %v283_v14 = vld [vmem:[#allocation7 + $0xa0] sm:$0xff]  ;;  %v284_v15 = vld [vmem:[#allocation7 + $0xa8] sm:$0xff]  ;;  %v740_v1 = vmov 2131351028   ;;  %s702_s22 = scalar_lea.vmem %s443_s21, 128  ;;  %p707_p11 = scmp.lt.s32.totalorder %s443_s21, %s443_s21 }
  0x3a   :  { %566 = vmatpush3.bf16.msra.mxu1 %v565_v5  ;;  %v592_v13 = vpack.c.bf16 %v266_v11, %v265_v10  ;;  %v267_v16 = vld [vmem:[#allocation7 + $0x20] sm:$0xff]  ;;  %v268_v17 = vld [vmem:[#allocation7 + $0x28] sm:$0xff]  ;;  %v571_v18 = vpack.c.bf16 %v284_v15, %v283_v14  ;;  %v285_v20 = vld [vmem:[#allocation7 + $0xb0] sm:$0xff]  ;;  %v741_v5 = vmov 2102212464   ;;  %p703_p10 = scmp.ne.s32.totalorder %s443_s21, %s702_s22  ;;  %p708_p12 = scmp.lt.s32.totalorder %s702_s22, %s702_s22 }
  0x3b   :  { %590 = vmatpush3.bf16.msra.mxu0 %v589_v9  ;;  %567 = vmatprep.subr.bf16.mxu1 %v735_v0  ;;  %v595_v19 = vpack.c.bf16 %v268_v17, %v267_v16  ;;  %v286_v21 = vld [vmem:[#allocation7 + $0xb8] sm:$0xff]  ;;  %v269_v22 = vld [vmem:[#allocation7 + $0x30] sm:$0xff]  ;;  %v287_v27 = vld [vmem:[#allocation7 + $0xc0] sm:$0xff]  ;;  %v742_v7 = vmov 920167782  }
  0x3c   :  { %591 = vmatprep.subr.bf16.mxu0 %v735_v0  ;;  %v270_v23 = vld [vmem:[#allocation7 + $0x38] sm:$0xff]  ;;  %v574_v24 = vpack.c.bf16 %v286_v21, %v285_v20  ;;  %v288_v28 = vld [vmem:[#allocation7 + $0xc8] sm:$0xff]  ;;  %v271_v30 = vld [vmem:[#allocation7 + $0x40] sm:$0xff]  ;;  %v743_v14 = vmov 1326507024   ;;  %p709_p13 = por %p708_p12, %p707_p11 }
  0x3d   :  { %v807_v25 = vld [vmem:[#allocation5] sm:$0xff]  ;;  %v598_v26 = vpack.c.bf16 %v270_v23, %v269_v22  ;;  %v272_v31 = vld [vmem:[#allocation7 + $0x48] sm:$0xff]  ;;  %v577_v33 = vpack.c.bf16 %v288_v28, %v287_v27  ;;  %v289_v36 = vld [vmem:[#allocation7 + $0xd0] sm:$0xff] }
  0x3e   :  { %569 = vmatpush3.bf16.msra.mxu1 %v568_v12  ;;  %v57_v29 = vand.u32 2139095040, %v807_v25  ;;  %v54_v34 = vand.u32 2147483647, %v807_v25  ;;  %v601_v35 = vpack.c.bf16 %v272_v31, %v271_v30  ;;  %v290_v37 = vld [vmem:[#allocation7 + $0xd8] sm:$0xff]  ;;  %v273_v39 = vld [vmem:[#allocation7 + $0x50] sm:$0xff]  ;;  %v291_v43 = vld [vmem:[#allocation7 + $0xe0] sm:$0xff]  ;;  %vm146_vm0 = vweird.f32 %v807_v25  ;;  %p710_p0 = pnand %p709_p13, %p703_p10 }
  0x3f   :  { %593 = vmatpush3.bf16.msra.mxu0 %v592_v13  ;;  %570 = vmatprep.subr.bf16.mxu1 %v735_v0  ;;  %v274_v40 = vld [vmem:[#allocation7 + $0x58] sm:$0xff]  ;;  %v580_v42 = vpack.c.bf16 %v290_v37, %v289_v36  ;;  %v292_v46 = vld [vmem:[#allocation7 + $0xe8] sm:$0xff]  ;;  %v275_v47 = vld [vmem:[#allocation7 + $0x60] sm:$0xff]  ;;  %vm56_vm8 = vcmp.lt.s32.totalorder %v807_v25, 0 }
  0x40   :  { %594 = vmatprep.subr.bf16.mxu0 %v735_v0  ;;  %v58_v32 = vshrl.u32 %v57_v29, 23  ;;  %v61_v44 = vand.u32 8388607, %v54_v34  ;;  %v604_v45 = vpack.c.bf16 %v274_v40, %v273_v39  ;;  %v276_v48 = vld [vmem:[#allocation7 + $0x68] sm:$0xff]  ;;  %v293_v49 = vld [vmem:[#allocation7 + $0xf0] sm:$0xff]  ;;  %v294_v51 = vld [vmem:[#allocation7 + $0xf8] sm:$0xff]  ;;  %v583_v55 = vpack.c.bf16 %v292_v46, %v291_v43 }
  0x41   :  { %v277_v52 = vld [vmem:[#allocation7 + $0x70] sm:$0xff]  ;;  %v278_v53 = vld [vmem:[#allocation7 + $0x78] sm:$0xff]  ;;  %v607_v56 = vpack.c.bf16 %v276_v48, %v275_v47  ;;  %v586_v3 = vpack.c.bf16 %v294_v51, %v293_v49  ;;  %vm55_vm9 = vcmp.le.f32.partialorder %v54_v34, 0.7853982 }
  0x42   :  { %572 = vmatpush3.bf16.msra.mxu1 %v571_v18  ;;  %v452_v38 = vadd.s32 4294967169, %v58_v32  ;;  %v62_v57 = vor.u32 8388608, %v61_v44  ;;  %v610_v4 = vpack.c.bf16 %v278_v53, %v277_v52 }
  0x43   :  { %596 = vmatpush3.bf16.msra.mxu0 %v595_v19  ;;  %573 = vmatprep.subr.bf16.mxu1 %v735_v0 }
  0x44   :  { %597 = vmatprep.subr.bf16.mxu0 %v735_v0  ;;  %v64_v41 = vadd.s32 1, %v452_v38  ;;  %v102_v16 = vshll.u32 %v62_v57, 8 }
  0x46   :  { %575 = vmatpush3.bf16.msra.mxu1 %v574_v24  ;;  %vm65_vm1 = vcmp.gt.s32.totalorder %v64_v41, 0 }
  0x47   :  { %599 = vmatpush3.bf16.msra.mxu0 %v598_v26  ;;  %576 = vmatprep.subr.bf16.mxu1 %v735_v0  ;;  %v66_v50 = vsel %vm65_vm1, %v64_v41, 0 }
  0x48   :  { %600 = vmatprep.subr.bf16.mxu0 %v735_v0  ;;  %v68_v54 = vand.u32 31, %v66_v50  ;;  %v67_v58 = vshrl.u32 %v66_v50, 5 }
  0x4a   :  { %578 = vmatpush3.bf16.msra.mxu1 %v577_v33  ;;  %v69_v59 = vsub.s32 32, %v68_v54  ;;  %v71_v61 = vshll.u32 %v738_v60, %v68_v54  ;;  %v74_v63 = vshll.u32 %v739_v62, %v68_v54  ;;  %v77_v2 = vshll.u32 %v740_v1, %v68_v54 }
  0x4b   :  { %602 = vmatpush3.bf16.msra.mxu0 %v601_v35  ;;  %579 = vmatprep.subr.bf16.mxu1 %v735_v0  ;;  %v80_v6 = vshll.u32 %v741_v5, %v68_v54  ;;  %v83_v8 = vshll.u32 %v742_v7, %v68_v54  ;;  %vm86_vm2 = vcmp.lt.s32.totalorder %v67_v58, 1  ;;  %vm89_vm3 = vcmp.lt.s32.totalorder %v67_v58, 4 }
  0x4c   :  { %603 = vmatprep.subr.bf16.mxu0 %v735_v0  ;;  %v70_v9 = vshrl.u32 %v738_v60, %v69_v59  ;;  %v72_v10 = vshrl.u32 %v739_v62, %v69_v59  ;;  %v75_v11 = vshrl.u32 %v740_v1, %v69_v59  ;;  %v78_v12 = vshrl.u32 %v741_v5, %v69_v59 }
  0x4d   :  { %v81_v13 = vshrl.u32 %v742_v7, %v69_v59  ;;  %v84_v15 = vshrl.u32 %v743_v14, %v69_v59  ;;  %vm87_vm4 = vcmp.lt.s32.totalorder %v67_v58, 2  ;;  %vm88_vm5 = vcmp.lt.s32.totalorder %v67_v58, 3 }
  0x4e   :  { %581 = vmatpush3.bf16.msra.mxu1 %v580_v42  ;;  %v73_v17 = vor.u32 %v72_v10, %v71_v61  ;;  %v76_v18 = vor.u32 %v75_v11, %v74_v63  ;;  %v79_v19 = vor.u32 %v78_v12, %v77_v2 }
  0x4f   :  { %605 = vmatpush3.bf16.msra.mxu0 %v604_v45  ;;  %582 = vmatprep.subr.bf16.mxu1 %v735_v0  ;;  %v82_v20 = vor.u32 %v81_v13, %v80_v6  ;;  %v85_v21 = vor.u32 %v84_v15, %v83_v8  ;;  %v52_v15 = vld [vmem:[#allocation2] sm:$0xff] }
  0x50   :  { %606 = vmatprep.subr.bf16.mxu0 %v735_v0  ;;  %v90_v22 = vsel %vm86_vm2, %v70_v9, %v73_v17  ;;  %v91_v23 = vsel %vm89_vm3, %v79_v19, 2102212464  ;;  %v94_v24 = vsel %vm86_vm2, %v73_v17, %v76_v18  ;;  %v98_v26 = vsel %vm86_vm2, %v76_v18, %v79_v19 }
  0x51   :  { %v92_v27 = vsel %vm88_vm5, %v76_v18, %v91_v23  ;;  %v95_v28 = vsel %vm89_vm3, %v82_v20, 920167782  ;;  %v99_v29 = vsel %vm89_vm3, %v85_v21, 1326507024 }
  0x52   :  { %584 = vmatpush3.bf16.msra.mxu1 %v583_v55  ;;  %v96_v30 = vsel %vm88_vm5, %v79_v19, %v95_v28  ;;  %v100_v31 = vsel %vm88_vm5, %v82_v20, %v99_v29  ;;  %v93_v32 = vsel %vm87_vm4, %v90_v22, %v92_v27 }
  0x53   :  { %608 = vmatpush3.bf16.msra.mxu0 %v607_v56  ;;  %585 = vmatprep.subr.bf16.mxu1 %v735_v0  ;;  %v101_v33 = vsel %vm87_vm4, %v98_v26, %v100_v31  ;;  %v109_v39 = vmul.u32 %v102_v16, %v93_v32 }
  0x54   :  { %609 = vmatprep.subr.bf16.mxu0 %v735_v0  ;;  %v97_v0 = vsel %vm87_vm4, %v94_v24, %v96_v30  ;;  %v826_v35 = vmul.u32.u64.low %v102_v16, %v101_v33  ;;  %v827_v36 = vmul.u32.u64.high %v102_v16, %v101_v33, %v826_v35 }
  0x55   :  { %v829_v37 = vmul.u32.u64.low %v102_v16, %v97_v0  ;;  %v830_v38 = vmul.u32.u64.high %v102_v16, %v97_v0, %v829_v37 }
  0x56   :  { %587 = vmatpush3.bf16.msra.mxu1 %v586_v3 }
  0x57   :  { %611 = vmatpush3.bf16.msra.mxu0 %v610_v4  ;;  %vm111_vm6 = vc.u32 %v827_v36, %v829_v37  ;;  %v112_v40 = vadd.s32 1, %v830_v38  ;;  %v110_v51 = vadd.s32 %v829_v37, %v827_v36 }
  0x59   :  { %v113_v41 = vsel %vm111_vm6, %v112_v40, %v830_v38 }
  0x5a   :  { %v114_v42 = vadd.s32 %v113_v41, %v109_v39 }
  0x5c   :  { %v115_v43 = vadd.s32 536870912, %v114_v42 }
  0x5e   :  { %v116_v44 = vshrl.u32 %v115_v43, 30 }
  0x60   :  { %v117_v45 = vshll.u32 %v116_v44, 30  ;;  %v140_v63 = vsub.s32 4, %v116_v44 }
  0x62   :  { %v118_v46 = vsub.s32 %v114_v42, %v117_v45  ;;  %v141_v3 = vsel %vm56_vm8, %v140_v63, %v116_v44 }
  0x63   :  { %v143_v6 = vsel %vm55_vm9, 0, %v141_v3 }
  0x64   :  { %v120_v47 = vsub.s32 0, %v118_v46  ;;  %v251_v7 = vadd.s32 3, %v143_v6  ;;  %v147_v9 = vand.u32 3, %v143_v6 }
  0x66   :  { %v453_v48 = vmin.u32 %v120_v47, %v118_v46  ;;  %v252_v8 = vand.u32 3, %v251_v7  ;;  %vm152_vm11 = vcmp.eq.s32.totalorder %v147_v9, 2  ;;  %vm149_vm13 = vcmp.eq.s32.totalorder %v147_v9, 0 }
  0x67   :  { %vm148_vm15 = vcmp.lt.s32.totalorder %v147_v9, 2 }
  0x68   :  { %v122_v49 = vclz %v453_v48  ;;  %vm257_vm10 = vcmp.eq.s32.totalorder %v252_v8, 2  ;;  %vm254_vm12 = vcmp.eq.s32.totalorder %v252_v8, 0  ;;  %vm253_vm14 = vcmp.lt.s32.totalorder %v252_v8, 2 }
  0x6a   :  { %v454_v50 = vadd.s32 4294967294, %v122_v49 }
  0x6c   :  { %vm455_vm7 = vcmp.lt.s32.totalorder %v454_v50, 0 }
  0x6d   :  { %v125_v52 = vsel %vm455_vm7, 0, %v454_v50 }
  0x6e   :  { %v126_v53 = vsub.s32 32, %v125_v52  ;;  %v127_v54 = vshll.u32 %v118_v46, %v125_v52  ;;  %v130_v55 = vsub.s32 4294967266, %v125_v52 }
  0x70   :  { %v128_v56 = vshrl.u32 %v110_v51, %v126_v53  ;;  %v131_v57 = vadd.s32 127, %v130_v55 }
  0x72   :  { %v129_v58 = vor.u32 %v128_v56, %v127_v54  ;;  %v132_v59 = vshll.u32 %v131_v57, 23 }
  0x74   :  { %v133_v60 = vor.u32 4788187, %v132_v59  ;;  %v136_v61 = vcvt.s32.f32 %v129_v58 }
  0x76   :  { %v134_v62 = vand.u32 2147483647, %v133_v60 }
  0x78   :  { %v137_v1 = vmul.f32 %v136_v61, %v134_v62 }
  0x7a   :  { %v138_v2 = vxor.u32 2147483648, %v137_v1 }
  0x7c   :  { %v139_v4 = vsel %vm56_vm8, %v138_v2, %v137_v1 }
  0x7d   :  { %v142_v5 = vsel %vm55_vm9, %v807_v25, %v139_v4 }
  0x7e   :  { %632 = vcosq.f32 %v142_v5 }
  0x7f   :  { %634 = vsinq.f32 %v142_v5 }
  0x88   :  { %v633_v10 = vpop.eup %632 }
  0x89   :  { %v635_v11 = vpop.eup %634  ;;  %v153_v12 = vxor.u32 2147483648, %v633_v10 }
  0x8a   :  { %v150_v13 = vxor.u32 2147483648, %v635_v11 }
  0x8b   :  { %v259_v34 = vsel %vm257_vm10, %v153_v12, %v635_v11  ;;  %v154_v14 = vsel %vm152_vm11, %v153_v12, %v635_v11 }
  0x8c   :  { %v256_v16 = vsel %vm254_vm12, %v633_v10, %v150_v13  ;;  %v151_v17 = vsel %vm149_vm13, %v633_v10, %v150_v13 }
  0x8d   :  { %v260_v18 = vsel %vm253_vm14, %v256_v16, %v259_v34  ;;  %v155_v19 = vsel %vm148_vm15, %v151_v17, %v154_v14 }
  0x8e   :  { %v261_v20 = vsel %vm146_vm0, nan, %v260_v18  ;;  %v156_v21 = vsel %vm146_vm0, nan, %v155_v19 }
  0x8f   :  { %v262_v22 = vmul.f32 %v261_v20, %v52_v15  ;;  %v157_v23 = vmul.f32 %v156_v21, %v52_v15 }
  0x91   :  { %527 = vmatmul.mubr.f32.vlgmr.msra.gmra.mrb[0].mxu1 %v262_v22  ;;  %562 = vmatmul.mubr.f32.vlgmr.msra.gmra.mrb[0].mxu0 %v157_v23 }
 0x164   :  { %v361_v24 = vpop.f32.mrb[0].mxu1  ;;  %v431_v26 = vpop.f32.mrb[0].mxu0 }
 0x165   :  { %v432_v27 = vadd.f32 %v431_v26, %v361_v24  ;;  %v528_v28 = vpop.f32.mrb[1].mxu1  ;;  %v563_v25 = vpop.f32.mrb[1].mxu0 }
 0x167   :  { %435 = vst [vmem:[#allocation8] sm:$0xff] %v432_v27 }
 0x168   :  { %713 = shalt.err (!%p710_p0)
}
 0x169   :  { %s714_s25 = scalar_lea.hbm %s856_s3, 128 }
 0x16a   :  { %p715_p1 = scmp.ne.s32.totalorder %s856_s3, %s714_s25  ;;  %p718_p2 = scmp.lt.u32.totalorder %s714_s25, %s856_s3 }
 0x16c   :  { %p720_p3 = pnand %p718_p2, %p715_p1 }
 0x16e   :  { %723 = shalt.err (!%p720_p3)
}
 0x16f   :  { %445 = dma.vmem_to_hbm [thread:$0]  %s443_s21, 128, %s856_s3, [#allocation4]  }
 0x170   :  { %728 = dma.done.wait [#allocation4], 128  }
 0x171   :  { %729 = vsyncadd [#allocation4], 4294967168 }
 0x172   :  { %449 = vsyncpa [#allocation3], 1 }
 0x173   :  { %450 = vsyncpa [#allocation6], 1 }
 0x174   :  { %451 = vsyncpa [#allocation4], 1 }

</bundles_post_ra>
